<compile_context>
chip_gen: v7x
topology: tpu7x:2x2x1
jax: 0.10.0
libtpu: 0.0.40
codegen_flags: <defaults>
</compile_context>

<pallas_src>
import functools
import math

import jax
import jax.numpy as jnp
from jax.experimental import pallas as pl
from jax.experimental.pallas import tpu as pltpu


def _label_smoothing_kernel(gt_ref, x_ref, out_ref, *,
                            padding_idx, confidence, smoothed,
                            const_gt0, const_other):
    x = x_ref[...].astype(jnp.float32)            # (tm, C) logits, C = vocab_size - 1
    gt = gt_ref[...]                              # (tm, 1) int32 class ids in [0, V)
    tm, c = x.shape

    # --- log_softmax statistics over the class (lane) axis ---
    m = jnp.max(x, axis=-1, keepdims=True)        # (tm, 1)
    shifted = x - m                               # (tm, C)
    lse = jnp.log(jnp.sum(jnp.exp(shifted), axis=-1, keepdims=True))   # (tm, 1)

    # Column j corresponds to vocabulary class j+1 (class 0 is the dropped column).
    col = jax.lax.broadcasted_iota(jnp.int32, (tm, c), 1)
    is_true = col == (gt - 1)                     # broadcast (tm,1) -> (tm,C)
    w = jnp.where(is_true, confidence, smoothed)  # target distribution of a non-padding row

    # sum_j t_j * logp_j  =  sum_j w_j * shifted_j  -  (sum_j w_j) * lse
    wdot = jnp.sum(w * shifted, axis=-1, keepdims=True)            # (tm, 1)
    has_true = jnp.logical_and(gt >= 1, gt <= c).astype(jnp.float32)
    w_sum = smoothed * c + (confidence - smoothed) * has_true      # (tm, 1)
    cross = wdot - w_sum * lse

    # sum_j t_j * log t_j  (per-row scalar: gt==0 -> all smoothed; else conf + (C-1) smoothed)
    ent = jnp.where(gt == 0, const_gt0, const_other)

    loss = ent - cross
    out_ref[...] = jnp.where(gt == padding_idx, 0.0, loss).astype(out_ref.dtype)


def _pick_row_tile(n_rows, num_classes, in_itemsize,
                   vmem_budget_bytes=12 * 1024 * 1024):
    """Pick the row tile: as large as the VMEM budget allows, multiple of 16."""
    # Per tiled row we pay roughly:
    #   2 * C * itemsize   double-buffered logits DMA buffers
    #   ~16 * C            f32 in-kernel working set (x, shifted, w, w*shifted)
    #   small              gt / out blocks
    per_row = 2 * num_classes * in_itemsize + 16 * num_classes + 64
    tm = vmem_budget_bytes // per_row
    tm = max(16, min(1024, (tm // 16) * 16))
    n_aligned = ((max(n_rows, 1) + 15) // 16) * 16   # do not tile wider than the problem
    return int(min(tm, n_aligned))


def label_smoothing_loss(input_probs, ground_truth, *, vocab_size, padding_idx,
                         confidence, tm=None):
    """Pallas implementation of LabelSmoothing.forward.

    input_probs:  (..., vocab_size - 1) float logits (f32 or bf16; DMA'd in native dtype)
    ground_truth: (...) int class indices in [0, vocab_size)
    returns:      (N,) float32 per-token KL loss, N = prod(leading dims)
    """
    c = vocab_size - 1
    x = input_probs.reshape(-1, c)                        # keep native dtype (bf16 -> half HBM traffic)
    gt = ground_truth.reshape(-1, 1).astype(jnp.int32)
    n = x.shape[0]

    if tm is None:
        tm = _pick_row_tile(n, c, x.dtype.itemsize)

    smoothed = (1.0 - confidence) / (vocab_size - 1)
    # Guard the logs: confidence == 1.0 (smoothed == 0) or confidence == 0.0 must not raise
    # at trace time; the corresponding x*log(x) terms are exactly 0.
    s_log_s = smoothed * math.log(smoothed) if smoothed > 0.0 else 0.0
    c_log_c = confidence * math.log(confidence) if confidence > 0.0 else 0.0
    const_gt0 = c * s_log_s                               # gt == 0: all C columns hold `smoothed`
    const_other = c_log_c + (c - 1) * s_log_s             # gt >= 1: one conf + (C-1) smoothed

    kernel = functools.partial(
        _label_smoothing_kernel,
        padding_idx=int(padding_idx),
        confidence=float(confidence),
        smoothed=float(smoothed),
        const_gt0=float(const_gt0),
        const_other=float(const_other),
    )

    out = pl.pallas_call(
        kernel,
        out_shape=jax.ShapeDtypeStruct((n, 1), jnp.float32),
        grid=(pl.cdiv(n, tm),),
        in_specs=[
            pl.BlockSpec((tm, 1), lambda i: (i, 0)),      # ground-truth ids
            pl.BlockSpec((tm, c), lambda i: (i, 0)),      # logits tile (full class axis)
        ],
        out_specs=pl.BlockSpec((tm, 1), lambda i: (i, 0)),
        compiler_params=pltpu.CompilerParams(
            dimension_semantics=("parallel",),            # shards rows over both v7x TCs
            vmem_limit_bytes=32 * 1024 * 1024,            # <= physical VMEM on v5e/v6e/v7x
        ),
    )(gt, x)
    return out[:, 0]


def label_smoothing_ref(input_probs, ground_truth, *, vocab_size, padding_idx, confidence):
    """Pure-JAX reference matching the PyTorch forward (element-wise formulation)."""
    c = vocab_size - 1
    smoothed = (1.0 - confidence) / (vocab_size - 1)
    x = input_probs.reshape(-1, c).astype(jnp.float32)
    logp = jax.nn.log_softmax(x, axis=-1)
    gt = ground_truth.reshape(-1)
    n = x.shape[0]
    w = jnp.full((n, vocab_size), smoothed, dtype=jnp.float32)
    w = w.at[jnp.arange(n), gt].set(confidence)
    w = jnp.where((gt == padding_idx)[:, None], 0.0, w)
    t = w[:, 1:]
    safe_log = jnp.log(jnp.where(t > 0, t, 1.0))
    elem = jnp.where(t > 0, t * (safe_log - logp), 0.0)
    return elem.sum(-1)


if __name__ == "__main__":
    # Module parameters (deterministic, in-script). The module's `weight` buffer is a
    # constant (1, vocab_size) array of smoothed_value; it is folded into scalar constants.
    vocab_size = 32
    padding_idx = 0
    confidence = 0.9

    key = jax.random.PRNGKey(0)

    # Case 1: bf16 logits, auto-selected row tile (single grid step).
    B, T = 2, 8
    k1, k2, k3, k4 = jax.random.split(key, 4)
    logits = jax.random.normal(k1, (B, T, vocab_size - 1), dtype=jnp.float32).astype(jnp.bfloat16)
    gt = jax.random.randint(k2, (B, T), 0, vocab_size, dtype=jnp.int32)
    gt = gt.at[:, -2:].set(padding_idx)                   # ensure padding tokens are present

    loss = label_smoothing_loss(
        logits, gt, vocab_size=vocab_size, padding_idx=padding_idx, confidence=confidence)
    loss = jax.block_until_ready(loss)
    ref = label_smoothing_ref(
        logits, gt, vocab_size=vocab_size, padding_idx=padding_idx, confidence=confidence)
    assert loss.shape == (B * T,)
    assert jnp.allclose(loss, ref, atol=1e-4, rtol=1e-4), (loss, ref)

    # Case 2: f32 logits, explicit small tile -> multi-step grid with a partial edge block
    # (exercises the pl.cdiv / clipped-block path).
    B2, T2 = 5, 8                                         # N = 40 rows, tm = 16 -> grid of 3
    logits2 = jax.random.normal(k3, (B2, T2, vocab_size - 1), dtype=jnp.float32)
    gt2 = jax.random.randint(k4, (B2, T2), 0, vocab_size, dtype=jnp.int32)
    gt2 = gt2.at[:, :1].set(padding_idx)

    loss2 = label_smoothing_loss(
        logits2, gt2, vocab_size=vocab_size, padding_idx=padding_idx,
        confidence=confidence, tm=16)
    loss2 = jax.block_until_ready(loss2)
    ref2 = label_smoothing_ref(
        logits2, gt2, vocab_size=vocab_size, padding_idx=padding_idx, confidence=confidence)
    assert loss2.shape == (B2 * T2,)
    assert jnp.allclose(loss2, ref2, atol=1e-4, rtol=1e-4), (loss2, ref2)

    print("KERNEL_OK")
</pallas_src>

<mosaic_0001>
module attributes {stable_mosaic.version = 11 : i64} {
  func.func @_label_smoothing_kernel(%arg0: i32, %arg1: memref<16x1xi32, #tpu.memory_space<vmem>>, %arg2: memref<16x31xbf16, #tpu.memory_space<vmem>>, %arg3: memref<16x1xf32, #tpu.memory_space<vmem>>) attributes {dimension_semantics = [#tpu.dimension_semantics<parallel>], iteration_bounds = array<i64: 1>, scalar_prefetch = 0 : i64, scratch_operands = 0 : i64, tpu.core_type = #tpu.core_type<tc>, window_params = [{transform_indices = @transform_0, window_bounds = array<i64: 16, 1>}, {transform_indices = @transform_1, window_bounds = array<i64: 16, 31>}, {transform_indices = @transform_2, window_bounds = array<i64: 16, 1>}]} {
    %c0 = arith.constant 0 : index
    %c0_0 = arith.constant 0 : index
    %0 = vector.load %arg2[%c0, %c0_0] : memref<16x31xbf16, #tpu.memory_space<vmem>>, vector<16x31xbf16>
    %1 = arith.extf %0 : vector<16x31xbf16> to vector<16x31xf32>
    %c0_1 = arith.constant 0 : index
    %c0_2 = arith.constant 0 : index
    %2 = vector.load %arg1[%c0_1, %c0_2] : memref<16x1xi32, #tpu.memory_space<vmem>>, vector<16x1xi32>
    %cst = arith.constant dense<0xFF800000> : vector<16xf32>
    %3 = vector.multi_reduction <maximumf>, %1, %cst [1] : vector<16x31xf32> to vector<16xf32>
    %4 = vector.shape_cast %3 : vector<16xf32> to vector<16x1xf32>
    %5 = vector.broadcast %4 : vector<16x1xf32> to vector<16x31xf32>
    %6 = arith.subf %1, %5 : vector<16x31xf32>
    %7 = math.exp %6 : vector<16x31xf32>
    %cst_3 = arith.constant dense<0.000000e+00> : vector<16xf32>
    %8 = vector.multi_reduction <add>, %7, %cst_3 [1] : vector<16x31xf32> to vector<16xf32>
    %9 = vector.shape_cast %8 : vector<16xf32> to vector<16x1xf32>
    %10 = math.log %9 : vector<16x1xf32>
    %11 = tpu.iota {dimensions = array<i32: 1>} : vector<16x31xi32>
    %c1_i32 = arith.constant 1 : i32
    %12 = vector.broadcast %c1_i32 : i32 to vector<16x1xi32>
    %13 = arith.subi %2, %12 : vector<16x1xi32>
    %14 = vector.broadcast %13 : vector<16x1xi32> to vector<16x31xi32>
    %15 = arith.cmpi eq, %11, %14 : vector<16x31xi32>
    %cst_4 = arith.constant 0.899999976 : f32
    %cst_5 = arith.constant 0.0032258064 : f32
    %16 = vector.broadcast %cst_4 : f32 to vector<16x31xf32>
    %17 = vector.broadcast %cst_5 : f32 to vector<16x31xf32>
    %18 = arith.select %15, %16, %17 : vector<16x31xi1>, vector<16x31xf32>
    %19 = arith.mulf %18, %6 : vector<16x31xf32>
    %cst_6 = arith.constant dense<0.000000e+00> : vector<16xf32>
    %20 = vector.multi_reduction <add>, %19, %cst_6 [1] : vector<16x31xf32> to vector<16xf32>
    %21 = vector.shape_cast %20 : vector<16xf32> to vector<16x1xf32>
    %c1_i32_7 = arith.constant 1 : i32
    %22 = vector.broadcast %c1_i32_7 : i32 to vector<16x1xi32>
    %23 = arith.cmpi sge, %2, %22 : vector<16x1xi32>
    %c31_i32 = arith.constant 31 : i32
    %24 = vector.broadcast %c31_i32 : i32 to vector<16x1xi32>
    %25 = arith.cmpi sle, %2, %24 : vector<16x1xi32>
    %26 = arith.andi %23, %25 : vector<16x1xi1>
    %27 = arith.extui %26 : vector<16x1xi1> to vector<16x1xi32>
    %28 = arith.sitofp %27 : vector<16x1xi32> to vector<16x1xf32>
    %cst_8 = arith.constant 0.896774172 : f32
    %29 = vector.broadcast %cst_8 : f32 to vector<16x1xf32>
    %30 = arith.mulf %29, %28 : vector<16x1xf32>
    %cst_9 = arith.constant 1.000000e-01 : f32
    %31 = vector.broadcast %cst_9 : f32 to vector<16x1xf32>
    %32 = arith.addf %31, %30 : vector<16x1xf32>
    %33 = arith.mulf %32, %10 : vector<16x1xf32>
    %34 = arith.subf %21, %33 : vector<16x1xf32>
    %c0_i32 = arith.constant 0 : i32
    %35 = vector.broadcast %c0_i32 : i32 to vector<16x1xi32>
    %36 = arith.cmpi eq, %2, %35 : vector<16x1xi32>
    %cst_10 = arith.constant -0.573657215 : f32
    %cst_11 = arith.constant -0.649976611 : f32
    %37 = vector.broadcast %cst_10 : f32 to vector<16x1xf32>
    %38 = vector.broadcast %cst_11 : f32 to vector<16x1xf32>
    %39 = arith.select %36, %37, %38 : vector<16x1xi1>, vector<16x1xf32>
    %40 = arith.subf %39, %34 : vector<16x1xf32>
    %c0_i32_12 = arith.constant 0 : i32
    %41 = vector.broadcast %c0_i32_12 : i32 to vector<16x1xi32>
    %42 = arith.cmpi eq, %2, %41 : vector<16x1xi32>
    %cst_13 = arith.constant 0.000000e+00 : f32
    %43 = vector.broadcast %cst_13 : f32 to vector<16x1xf32>
    %44 = arith.select %42, %43, %40 : vector<16x1xi1>, vector<16x1xf32>
    %c0_14 = arith.constant 0 : index
    %c0_15 = arith.constant 0 : index
    %45 = vector.load %arg3[%c0_14, %c0_15] : memref<16x1xf32, #tpu.memory_space<vmem>>, vector<16x1xf32>
    tpu.vector_store %arg3[%c0_14, %c0_15], %44 {strides = array<i32>} : memref<16x1xf32, #tpu.memory_space<vmem>>, vector<16x1xf32>,
    return
  }
  func.func @transform_0(%arg0: i32) -> (i32, i32) {
    %c0_i32 = arith.constant 0 : i32
    %c0_i32_0 = arith.constant 0 : i32
    return %arg0, %c0_i32 : i32, i32
  }
  func.func @transform_1(%arg0: i32) -> (i32, i32) {
    %c0_i32 = arith.constant 0 : i32
    %c0_i32_0 = arith.constant 0 : i32
    return %arg0, %c0_i32 : i32, i32
  }
  func.func @transform_2(%arg0: i32) -> (i32, i32) {
    %c0_i32 = arith.constant 0 : i32
    %c0_i32_0 = arith.constant 0 : i32
    return %arg0, %c0_i32 : i32, i32
  }
}

</mosaic_0001>

<bundles_post_ra>
// kernel: tpu_custom_call.1
= control target key start
LH: loop header
LB: loop body
LE: loop exit
PB: predicated region body
PF: predicated region fallthrough
CT: control target
= control target key end

     0   :  { %vm17_vm0 = vcmask 252928   ;;  %v117_v1 = vmov 0   ;;  %v40_v12 = vlaneseq  ;;  %v118_v20 = vmov 0.0032258064   ;;  %s173_s1 = inlined_call_operand.vmem [shape: bf16[16,31], index: 1, kind: input, shape index: {}]   ;;  %s174_s0 = inlined_call_operand.vmem [shape: s32[16,1], index: 0, kind: input, shape index: {}]   ;;  %s175_s2 = inlined_call_operand.vmem [shape: f32[16,1], index: 2, kind: output, shape index: {}]  }
   0x1   :  { %v100_v0 = vld [vmem:[%s173_s1] sm:$0xff]   ;;  %107 = vset.pattern.permute.xlu1 %v117_v1  ;;  %v147_v3 = vld [vmem:[%s174_s0 + $0x8] sm:$0xff]  ;;  %108 = vset.pattern.permute.xlu0 %v117_v1  ;;  %v119_v32 = vmov 0.0   ;;  %v120_v45 = vmov -0.6499766   ;;  %vm88_vm11 = vcmask 7168  }
   0x2   :  { %v142_v2 = vld [vmem:[%s174_s0] sm:$0xff]  ;;  %v101_v4 = vunpack.c.l.bf16 %v100_v0  ;;  %v102_v5 = vunpack.c.h.bf16 %v100_v0  ;;  %v96_v8 = vadd.s32 4294967295, %v147_v3  ;;  %v41_v17 = vand.u32 127, %v40_v12 }
   0x3   :  { %v95_v6 = vadd.s32 4294967295, %v142_v2  ;;  %vm62_vm3 = vcmp.ge.s32.totalorder %v142_v2, 1  ;;  %vm64_vm4 = vcmp.le.s32.totalorder %v142_v2, 31  ;;  %vm63_vm6 = vcmp.ge.s32.totalorder %v147_v3, 1 }
   0x4   :  { %v18_v7 = vsel %vm17_vm0, %v101_v4, -inf  ;;  %v21_v9 = vsel %vm17_vm0, %v102_v5, -inf  ;;  %vm66_vm5 = vmand %vm62_vm3, %vm64_vm4  ;;  %vm65_vm7 = vcmp.le.s32.totalorder %v147_v3, 31  ;;  %vm80_vm9 = vcmp.eq.s32.totalorder %v142_v2, 0 }
   0x5   :  { %45 = vperm.xlu1 %107, %v95_v6   ;;  %19 = vmax.xlane.f32.xlu0 %v18_v7  ;;  %v97_v33 = vsel %vm66_vm5, 1.0, %v119_v32  ;;  %vm67_vm8 = vmand %vm63_vm6, %vm65_vm7  ;;  %v82_v46 = vsel %vm80_vm9, -0.5736572, %v120_v45  ;;  %vm81_vm10 = vcmp.eq.s32.totalorder %v147_v3, 0 }
   0x6   :  { %v72_v35 = vmul.f32 0.8967742, %v97_v33  ;;  %v98_v36 = vsel %vm67_vm8, 1.0, %v119_v32  ;;  %v83_v51 = vsel %vm81_vm10, -0.5736572, %v120_v45 }
   0x7   :  { %v73_v38 = vmul.f32 0.8967742, %v98_v36 }
   0x8   :  { %v74_v37 = vadd.f32 0.1, %v72_v35 }
   0x9   :  { %48 = vperm.xlu1 %107, %v96_v8   ;;  %22 = vmax.xlane.f32.xlu0 %v21_v9  ;;  %v75_v43 = vadd.f32 0.1, %v73_v38 }
  0x84   :  { %v46_v15 = vpop.permute.xlu1 %45 }
  0x85   :  { %vm50_vm1 = vcmp.eq.s32.totalorder %v41_v17, %v46_v15 }
  0x86   :  { %v52_v21 = vsel %vm50_vm1, 0.9, %v118_v20 }
  0x88   :  { %v49_v19 = vpop.permute.xlu1 %48 }
  0x89   :  { %vm51_vm2 = vcmp.eq.s32.totalorder %v41_v17, %v49_v19 }
  0x8a   :  { %v53_v25 = vsel %vm51_vm2, 0.9, %v118_v20 }
  0x92   :  { %v20_v10 = vpop.xlane.xlu0 %19 }
  0x93   :  { %v24_v11 = vsub.f32 %v101_v4, %v20_v10 }
  0x95   :  { %v26_v13 = vmul.f32 1.442695, %v24_v11  ;;  %v54_v24 = vmul.f32 %v52_v21, %v24_v11 }
  0x96   :  { %v23_v14 = vpop.xlane.xlu0 %22 }
  0x97   :  { %109 = vpow2.f32 %v26_v13  ;;  %v25_v16 = vsub.f32 %v102_v5, %v23_v14  ;;  %v56_v28 = vsel %vm17_vm0, %v54_v24, 0.0 }
  0x99   :  { %v28_v18 = vmul.f32 1.442695, %v25_v16  ;;  %v55_v29 = vmul.f32 %v53_v25, %v25_v16 }
  0x9b   :  { %111 = vpow2.f32 %v28_v18  ;;  %v59_v30 = vsel %vm17_vm0, %v55_v29, 0.0 }
  0xa1   :  { %v110_v22 = vpop.eup %109 }
  0xa2   :  { %v30_v23 = vsel %vm17_vm0, %v110_v22, 0.0 }
  0xa3   :  { %31 = vadd.xlane.f32.xlu0 %v30_v23 }
  0xa5   :  { %v112_v26 = vpop.eup %111 }
  0xa6   :  { %v33_v27 = vsel %vm17_vm0, %v112_v26, 0.0 }
  0xa7   :  { %34 = vadd.xlane.f32.xlu1 %v33_v27  ;;  %57 = vadd.xlane.f32.xlu0 %v56_v28 }
  0xab   :  { %60 = vadd.xlane.f32.xlu0 %v59_v30 }
 0x130   :  { %v32_v31 = vpop.xlane.xlu0 %31 }
 0x131   :  { %113 = vlog2.f32 %v32_v31 }
 0x134   :  { %v35_v34 = vpop.xlane.xlu1 %34  ;;  %v58_v41 = vpop.xlane.xlu0 %57 }
 0x135   :  { %115 = vlog2.f32 %v35_v34 }
 0x138   :  { %v61_v52 = vpop.xlane.xlu0 %60 }
 0x13b   :  { %v114_v39 = vpop.eup %113 }
 0x13c   :  { %v37_v40 = vmul.f32 0.6931472, %v114_v39 }
 0x13e   :  { %v76_v42 = vmul.f32 %v74_v37, %v37_v40 }
 0x13f   :  { %v116_v44 = vpop.eup %115 }
 0x140   :  { %v78_v47 = vsub.f32 %v58_v41, %v76_v42  ;;  %v39_v48 = vmul.f32 0.6931472, %v116_v44 }
 0x142   :  { %v84_v49 = vsub.f32 %v82_v46, %v78_v47  ;;  %v77_v50 = vmul.f32 %v75_v43, %v39_v48 }
 0x144   :  { %v86_v53 = vsel %vm80_vm9, 0.0, %v84_v49  ;;  %v79_v54 = vsub.f32 %v61_v52, %v77_v50 }
 0x145   :  { %89 = vst.msk [vmem:[%s175_s2] sm:$0xff] %vm88_vm11, %v86_v53 }
 0x146   :  { %v85_v55 = vsub.f32 %v83_v51, %v79_v54 }
 0x148   :  { %v87_v56 = vsel %vm81_vm10, 0.0, %v85_v55 }
 0x149   :  { %90 = vst.msk [vmem:[%s175_s2 + $0x8] sm:$0xff] %vm88_vm11, %v87_v56 }

</bundles_post_ra>
